<compile_context>
chip_gen: v7x
topology: tpu7x:2x2x1
jax: 0.10.0
libtpu: 0.0.40
codegen_flags: <defaults>
</compile_context>

<pallas_src>
import jax
import jax.numpy as jnp
from jax import lax
from jax.experimental import pallas as pl
from jax.experimental.pallas import tpu as pltpu

KH = KW = 5
K_PAD = 128   # 75 taps + 1 bias row, zero-padded to a fully lane-dense 128


def _fused_dsep_matmul_kernel(p_ref, w_ref, o_ref):
    """One grid step: (B*OH*OW, K_PAD) @ (K_PAD, Cout) on the MXU."""
    o_ref[...] = jnp.dot(
        p_ref[...], w_ref[...], preferred_element_type=jnp.float32
    ).astype(o_ref.dtype)


def _pick_batch_block(n):
    """Largest B <= 8 dividing N that still leaves >= 2 grid steps (v7x)."""
    best = 1
    for b in range(1, min(8, n) + 1):
        if n % b == 0 and n // b >= 2:
            best = b
    return best


def _im2col(x_nhwc, oh, ow):
    """(N,H,W,Cin) -> (N, OH*OW, KH*KW*Cin) with column order (kh, kw, c)."""
    n, _, _, cin = x_nhwc.shape
    cols = []
    for kh in range(KH):
        for kw in range(KW):
            cols.append(x_nhwc[:, kh:kh + oh, kw:kw + ow, :])
    return jnp.concatenate(cols, axis=-1).reshape(n, oh * ow, KH * KW * cin)


def depthwise_block(x_nchw, dw_w, dw_b, pw_w, pw_b):
    """x_nchw: (N, Cin, H, W); returns (N, Cout, OH, OW) to match PyTorch."""
    N, Cin, H, W = x_nchw.shape
    Cout = pw_w.shape[1]
    OH, OW = H - KH + 1, W - KW + 1
    M = OH * OW                                    # 144 output pixels / image
    K = KH * KW * Cin                              # 75 fused taps

    # ---- wrapper-side im2col (lane-dense patch matrix, bias column folded) ----
    x_nhwc = jnp.transpose(x_nchw, (0, 2, 3, 1)).astype(jnp.float32)
    patch = _im2col(x_nhwc, OH, OW)                          # (N, M, K)
    ones = jnp.ones((N, M, 1), jnp.float32)
    patch = jnp.concatenate([patch, ones], axis=-1)          # (N, M, K+1)
    patch = jnp.pad(patch, ((0, 0), (0, 0), (0, K_PAD - (K + 1))))
    patch2d = patch.reshape(N * M, K_PAD)                    # (N*144, 128)

    # ---- host-side fusion: depthwise-then-pointwise == one K contraction ----
    dw_w = dw_w.astype(jnp.float32)
    dw_b = dw_b.astype(jnp.float32)
    pw_w = pw_w.astype(jnp.float32)
    pw_b = pw_b.astype(jnp.float32)
    w_eff = (dw_w[:, :, :, None] * pw_w[None, None, :, :]).reshape(K, Cout)
    b_eff = (pw_b + dw_b @ pw_w).reshape(1, Cout)
    w_aug = jnp.concatenate([w_eff, b_eff], axis=0)          # (76, Cout)
    w_aug = jnp.pad(w_aug, ((0, K_PAD - (K + 1)), (0, 0)))   # (128, Cout)

    # ---- batch images per grid step, keep >= 2 parallel steps when N >= 2 ----
    B = _pick_batch_block(N)
    MB = B * M                                               # rows per step
    grid = (N // B,)

    out2d = pl.pallas_call(
        _fused_dsep_matmul_kernel,
        out_shape=jax.ShapeDtypeStruct((N * M, Cout), jnp.float32),
        grid_spec=pltpu.PrefetchScalarGridSpec(
            num_scalar_prefetch=0,
            grid=grid,
            in_specs=[
                pl.BlockSpec((MB, K_PAD), lambda i: (i, 0)),
                pl.BlockSpec((K_PAD, Cout), lambda i: (0, 0)),  # resident weight
            ],
            out_specs=pl.BlockSpec((MB, Cout), lambda i: (i, 0)),
        ),
        compiler_params=pltpu.CompilerParams(
            dimension_semantics=("parallel",)),
    )(patch2d, w_aug)

    out_nhwc = out2d.reshape(N, OH, OW, Cout)
    return jnp.transpose(out_nhwc, (0, 3, 1, 2)).astype(x_nchw.dtype)


def _reference(x_nchw, dw_w, dw_b, pw_w, pw_b):
    """Pure-JAX reference using lax.conv (NCHW, matching torch semantics)."""
    Cin = x_nchw.shape[1]
    dw_oihw = jnp.transpose(dw_w, (2, 0, 1))[:, None, :, :]       # (Cin,1,KH,KW)
    dn = lax.conv_dimension_numbers(x_nchw.shape, dw_oihw.shape,
                                    ("NCHW", "OIHW", "NCHW"))
    y = lax.conv_general_dilated(x_nchw, dw_oihw, (1, 1), "VALID",
                                 feature_group_count=Cin,
                                 dimension_numbers=dn)
    y = y + dw_b[None, :, None, None]
    pw_oihw = jnp.transpose(pw_w, (1, 0))[:, :, None, None]       # (Cout,Cin,1,1)
    dn2 = lax.conv_dimension_numbers(y.shape, pw_oihw.shape,
                                     ("NCHW", "OIHW", "NCHW"))
    z = lax.conv_general_dilated(y, pw_oihw, (1, 1), "VALID",
                                 dimension_numbers=dn2)
    return z + pw_b[None, :, None, None]


if __name__ == "__main__":
    N, Cin, H, W = 2, 3, 16, 16
    Cout = 128

    key = jax.random.PRNGKey(0)
    kx, kdw, kdb, kpw, kpb = jax.random.split(key, 5)

    x = jax.random.normal(kx, (N, Cin, H, W), dtype=jnp.float32)
    # Deterministic synthetic parameters (shapes match the nn.Module).
    dw_w = jax.random.normal(kdw, (KH, KW, Cin), dtype=jnp.float32) * 0.1
    dw_b = jax.random.normal(kdb, (Cin,), dtype=jnp.float32) * 0.1
    pw_w = jax.random.normal(kpw, (Cin, Cout), dtype=jnp.float32) * 0.1
    pw_b = jax.random.normal(kpb, (Cout,), dtype=jnp.float32) * 0.1

    out = jax.block_until_ready(depthwise_block(x, dw_w, dw_b, pw_w, pw_b))
    ref = jax.block_until_ready(_reference(x, dw_w, dw_b, pw_w, pw_b))

    assert out.shape == (N, Cout, H - 4, W - 4), out.shape
    assert jnp.allclose(out, ref, atol=1e-4, rtol=1e-4), "mismatch vs reference"

    print("KERNEL_OK")
</pallas_src>

<mosaic_0001>
module attributes {stable_mosaic.version = 11 : i64} {
  func.func @_fused_dsep_matmul_kernel(%arg0: i32, %arg1: memref<144x128xf32, #tpu.memory_space<vmem>>, %arg2: memref<128x128xf32, #tpu.memory_space<vmem>>, %arg3: memref<144x128xf32, #tpu.memory_space<vmem>>) attributes {dimension_semantics = [#tpu.dimension_semantics<parallel>], iteration_bounds = array<i64: 2>, scalar_prefetch = 0 : i64, scratch_operands = 0 : i64, tpu.core_type = #tpu.core_type<tc>, window_params = [{transform_indices = @transform_0, window_bounds = array<i64: 144, 128>}, {pipeline_mode = #tpu.pipeline_mode<synchronous>, transform_indices = @transform_1, window_bounds = array<i64: 128, 128>}, {transform_indices = @transform_2, window_bounds = array<i64: 144, 128>}]} {
    %c0 = arith.constant 0 : index
    %c0_0 = arith.constant 0 : index
    %0 = vector.load %arg1[%c0, %c0_0] : memref<144x128xf32, #tpu.memory_space<vmem>>, vector<144x128xf32>
    %c0_1 = arith.constant 0 : index
    %c0_2 = arith.constant 0 : index
    %1 = vector.load %arg2[%c0_1, %c0_2] : memref<128x128xf32, #tpu.memory_space<vmem>>, vector<128x128xf32>
    %cst = arith.constant dense<0.000000e+00> : vector<144x128xf32>
    %2 = tpu.matmul %0, %1, %cst {dimension_numbers = #tpu.dot_dimension_numbers<[1], [0], [0], [1], [0, 0, 1, 1], [], []>} : vector<144x128xf32>, vector<128x128xf32>, vector<144x128xf32> -> vector<144x128xf32>
    %c0_3 = arith.constant 0 : index
    %c0_4 = arith.constant 0 : index
    %3 = vector.load %arg3[%c0_3, %c0_4] : memref<144x128xf32, #tpu.memory_space<vmem>>, vector<144x128xf32>
    tpu.vector_store %arg3[%c0_3, %c0_4], %2 {strides = array<i32>} : memref<144x128xf32, #tpu.memory_space<vmem>>, vector<144x128xf32>,
    return
  }
  func.func @transform_0(%arg0: i32) -> (i32, i32) {
    %c0_i32 = arith.constant 0 : i32
    %c0_i32_0 = arith.constant 0 : i32
    return %arg0, %c0_i32 : i32, i32
  }
  func.func @transform_1(%arg0: i32) -> (i32, i32) {
    %c0_i32 = arith.constant 0 : i32
    %c0_i32_0 = arith.constant 0 : i32
    %c0_i32_1 = arith.constant 0 : i32
    return %c0_i32, %c0_i32_0 : i32, i32
  }
  func.func @transform_2(%arg0: i32) -> (i32, i32) {
    %c0_i32 = arith.constant 0 : i32
    %c0_i32_0 = arith.constant 0 : i32
    return %arg0, %c0_i32 : i32, i32
  }
}

</mosaic_0001>

<bundles_post_ra>
// kernel: tpu_custom_call.1
= control target key start
LH: loop header
LB: loop body
LE: loop exit
PB: predicated region body
PF: predicated region fallthrough
CT: control target
= control target key end

     0   :  { %7 = vsyncpa [#allocation3], 0  ;;  %s1103_s0 = inlined_call_operand.hbm [shape: f32[288,128], index: 0, kind: input, shape index: {}]   ;;  %s1104_s1 = inlined_call_operand.hbm [shape: f32[128,128], index: 1, kind: input, shape index: {}]   ;;  %s1105_s2 = inlined_call_operand.hbm [shape: f32[288,128], index: 2, kind: output, shape index: {}]  }
   0x1   :  { %9 = vsyncpa [#allocation3 + $0x1], 0 }
   0x2   :  { %10 = vsyncpa [#allocation6], 0 }
   0x3   :  { %11 = vsyncpa [#allocation4], 0 }
   0x4   :  { %13 = vsyncpa [#allocation4 + $0x1], 0  ;;  %s851_s9 = smov 0   ;;  %s853_s10 = smov 0  }
   0x5   :  { %s855_s11 = smov 0   ;;  %s857_s12 = smov 0  }
   0x6 LB: > { %s872_s13 = sadd.s32 4294967295, %s827_s12   ;;  %s483_s14 = sadd.s32 4294967294, %s827_s12   ;;  %s827_s12 = sphi %s857_s12, %s1125_s12   ;;  %s823_s11 = sphi %s855_s11, %s1124_s11   ;;  %s819_s10 = sphi %s853_s10, %s1123_s10   ;;  %s815_s9 = sphi %s851_s9, %s1122_s9  }
   0x7   : > { %p39_p0 = scmp.ne.s32.totalorder %s819_s10, %s815_s9  ;;  %p1106_p1 = scmp.eq.s32.totalorder %s872_s13, 0 }
   0x8   : > { %p90_p3 = scmp.eq.s32.totalorder %s483_s14, 1  ;;  %p484_p5 = scmp.ge.s32.totalorder %s827_s12, 1 }
   0x9   : > { %p881_p4 = por %p1106_p1, %p39_p0  ;;  %p97_p7 = scmp.lt.s32.totalorder %s827_s12, 3 }
   0xa   : > { %p886_p6 = por %p90_p3, %p39_p0  ;;  %s829_s18 = smov [#allocation5]  }
   0xb   : > { %s1109_s15 = scalar_select %p881_p4, 1, 0 }
   0xc   : > { %s1110_s16 = scalar_select %p886_p6, 1, 0 }
   0xd   : > { %p891_p8 = pnand %p484_p5, %p97_p7  ;;  %s109_s19 = sshll.u32 %s829_s18, 4  ;;  %s895_s19 = int_to_ptr.vmem [resolvable:$true] %s109_s19 }
   0xe   : > { %s907_s21 = sadd.s32 1, %s827_s12   ;;  %s26_s22 = sadd.s32 1, %s823_s11 }
   0xf   : > { %s1111_s17 = scalar_select %p891_p8, 1, 0 }
  0x10   : > { %p646_p9 = pneg %p891_p8  ;;  %s23_s23 = ssub.s32 %s827_s12, %s907_s21 }
  0x11   : > { %s699_s26 = scalar_lea.hbm %s1104_s1, 2048 }
  0x12   : > { %p902_p11 = pnand %p646_p9, %p1106_p1  ;;  %p700_p12 = scmp.ne.s32.totalorder %s1104_s1, %s699_s26 }
  0x13   : > { %p706_p5 = scmp.lt.u32.totalorder %s699_s26, %s1104_s1 }
  0x14   : > { %p701_p13 = pneg %p902_p11 }
  0x16   : > { %p702_p0 = pnand %p701_p13, %p700_p12 }
  0x18   : > { %p703_p3 = pneg %p702_p0 }
  0x1a   : > { %p708_p7 = pnand %p706_p5, %p703_p3 }
  0x1c   : > { %711 = shalt.err (!%p708_p7)
}
  0x1d   : > { %s712_s3 = scalar_lea.vmem %s895_s19, 2048  ;;  %p720_p2 = scmp.lt.s32.totalorder %s895_s19, %s895_s19 }
  0x1e   : > { %p713_p9 = scmp.ne.s32.totalorder %s895_s19, %s712_s3  ;;  %p721_p6 = scmp.lt.s32.totalorder %s712_s3, %s712_s3 }
  0x20   : > { %p715_p10 = pnand %p713_p9, %p701_p13  ;;  %p722_p4 = por %p721_p6, %p720_p2 }
  0x22   : > { %p716_p1 = pneg %p715_p10 }
  0x24   : > { %p723_p8 = pnand %p722_p4, %p716_p1 }
  0x26   : > { %726 = shalt.err (!%p723_p8)
}
  0x27   : > { %s830_s4 = smov 128   ;;  %s831_s5 = smov 8  }
  0x28   : > { %649 = dma.hbm_to_vmem [thread:$0]  (!%p902_p11), %s1104_s1, 2048, %s895_s19, [#allocation6], %s830_s4, %s830_s4, %s831_s5  }
  0x29   : > { %p24_p1 = scmp.eq.s32.totalorder %s23_s23, 0  ;;  %p33_p2 = scmp.ne.s32.totalorder %s823_s11, %s819_s10 }
  0x2a   : > { %p34_p4 = scmp.eq.s32.totalorder %s827_s12, 0  ;;  %p659_p6 = scmp.lt.s32.totalorder %s827_s12, 2 }
  0x2b   : > { %s941_s8 = scalar_select %p24_p1, %s823_s11, %s26_s22  }
  0x2c   : > { %p35_p8 = por %p34_p4, %p33_p2  ;;  %p1113_p10 = scmp.eq.s32.totalorder %s872_s13, 1 }
  0x2d   : > { %s123_s18 = sand.u32 1, %s823_s11   ;;  %s493_s20 = smul.u32 2304, %s827_s12 }
  0x2e   : > { %p945_p12 = por %p1113_p10, %p33_p2  ;;  %s636_s24 = smul.u32 144, %s123_s18 }
  0x2f   : > { %p951_p13 = pnand %p659_p6, %p35_p8  ;;  %s958_s22 = scalar_lea.hbm %s1103_s0, %s493_s20 }
  0x30   : > { %s127_s26 = scalar_lea.vmem [#allocation2], %s636_s24  ;;  %s962_s28 = scalar_lea.sflag [#allocation3], %s123_s18 }
  0x31   : > { %s134_s27 = sshll.u32 %s127_s26, 4  ;;  %s727_s29 = scalar_lea.hbm %s958_s22, 2304  ;;  %s960_s27 = int_to_ptr.vmem [resolvable:$true] %s134_s27 }
  0x32   : > { %p728_p11 = scmp.ne.s32.totalorder %s958_s22, %s727_s29  ;;  %p729_p0 = pneg %p951_p13 }
  0x33   : > { %s732_s6 = scalar_lea.hbm %s1103_s0, 4608  ;;  %p733_p7 = scmp.lt.u32.totalorder %s958_s22, %s1103_s0 }
  0x34   : > { %p730_p3 = pnand %p729_p0, %p728_p11  ;;  %p734_p9 = scmp.lt.u32.totalorder %s732_s6, %s727_s29 }
  0x35   : > { %p736_p2 = scmp.lt.u32.totalorder %s727_s29, %s958_s22 }
  0x36   : > { %p731_p5 = pneg %p730_p3  ;;  %p735_p1 = por %p734_p9, %p733_p7 }
  0x38   : > { %p737_p4 = por %p736_p2, %p735_p1 }
  0x3a   : > { %p738_p6 = pnand %p737_p4, %p731_p5 }
  0x3c   : > { %741 = shalt.err (!%p738_p6)
}
  0x3d   : > { %s742_s18 = scalar_lea.vmem %s960_s27, 2304  ;;  %s832_s24 = smov [#allocation2]  }
  0x3e   : > { %p743_p8 = scmp.ne.s32.totalorder %s960_s27, %s742_s18  ;;  %s747_s19 = sshll.u32 %s832_s24, 4  ;;  %s748_s19 = int_to_ptr.vmem [resolvable:$false] %s747_s19 }
  0x3f   : > { %s749_s23 = scalar_lea.vmem %s748_s19, 4608  ;;  %p750_p3 = scmp.lt.s32.totalorder %s960_s27, %s748_s19 }
  0x40   : > { %p745_p10 = pnand %p743_p8, %p729_p0  ;;  %p751_p7 = scmp.lt.s32.totalorder %s749_s23, %s742_s18 }
  0x42   : > { %p746_p11 = pneg %p745_p10  ;;  %p752_p9 = por %p751_p7, %p750_p3 }
  0x44   : > { %p753_p1 = pnand %p752_p9, %p746_p11 }
  0x46   : > { %756 = shalt.err (!%p753_p1)
}
  0x47   : > { %653 = dma.hbm_to_vmem [thread:$0]  (!%p951_p13), %s958_s22, 2304, %s960_s27, %s962_s28, %s830_s4, %s830_s4, %s831_s5  }
  0x48   : > { %p1116_p0 = scmp.ne.s32.totalorder %s1111_s17, 0 }
  0x49   : > { %s996_s26 = sand.u32 (!%p1116_p0), 1, %s819_s10   ;;  %p1117_p5 = scmp.ne.s32.totalorder (!%p1116_p0), %s1109_s15, 0 }
  0x4a   : > { %146 = sbr.rel (%p1116_p0) target bundleno = 364 (0x16c), region = 28  ;;  %s149_s30 = scalar_lea.sflag (!%p1116_p0), [#allocation3], %s996_s26 }
  0x4b   : > { %s637_s29 = smul.u32 (!%p1116_p0), 144, %s996_s26 }
  0x4d   : > { %s1002_s25 = scalar_lea.vmem (!%p1116_p0), [#allocation2], %s637_s29 }
  0x51   : > { %802 = dma.done.wait (%p1117_p5), %s149_s30, 2304  }
  0x52   : > { %804 = vsyncadd (%p1117_p5), %s149_s30, 4294964992  ;;  %p1118_p13 = scmp.eq.s32.totalorder %s872_s13, 0 }
  0x54   : > { %806 = dma.done.wait (%p1118_p13), [#allocation6], 2048   ;;  %p1119_p2 = pmov %p1118_p13 }
  0x55   : > { %v197_v0 = vld [vmem:[#allocation5] sm:$0xff]  ;;  %v198_v1 = vld [vmem:[#allocation5 + $0x8] sm:$0xff]  ;;  %v199_v2 = vld [vmem:[#allocation5 + $0x10] sm:$0xff]  ;;  %s1032_s15 = scalar_lea.vmem [#allocation7], %s637_s29  ;;  %s494_s17 = smul.u32 2304, %s872_s13 }
  0x56   : > { %808 = vsyncadd (%p1119_p2), [#allocation6], 4294965248  ;;  %v588_v3 = vpack.c.bf16 %v198_v1, %v197_v0  ;;  %v200_v4 = vld [vmem:[#allocation5 + $0x18] sm:$0xff]  ;;  %v201_v6 = vld [vmem:[#allocation5 + $0x20] sm:$0xff]  ;;  %s400_s4 = sshll.u32 %s1032_s15, 4  ;;  %s387_s13 = scalar_lea.sflag [#allocation4], %s996_s26  ;;  %s1057_s4 = int_to_ptr.vmem [resolvable:$true] %s400_s4 }
  0x57   : > { %v592_v5 = vpack.c.bf16 %v200_v4, %v199_v2  ;;  %v202_v7 = vld [vmem:[#allocation5 + $0x28] sm:$0xff]  ;;  %v179_v9 = vld [vmem:[%s1002_s25] sm:$0xff]  ;;  %v204_v11 = vld [vmem:[#allocation5 + $0x38] sm:$0xff]  ;;  %s1055_s27 = scalar_lea.hbm %s1105_s2, %s494_s17  ;;  %s757_s28 = scalar_lea.vmem %s1057_s4, 2304 }
  0x58   : > { %589 = vmatprep.subr.bf16.mxu0 %v588_v3  ;;  %620 = vmatprep.subr.bf16.mxu1 %v588_v3  ;;  %v596_v8 = vpack.c.bf16 %v202_v7, %v201_v6  ;;  %v203_v10 = vld [vmem:[#allocation5 + $0x30] sm:$0xff]  ;;  %v205_v14 = vld [vmem:[#allocation5 + $0x40] sm:$0xff]  ;;  %v206_v15 = vld [vmem:[#allocation5 + $0x48] sm:$0xff]  ;;  %p758_p4 = scmp.ne.s32.totalorder %s1057_s4, %s757_s28  ;;  %s833_s3 = smov [#allocation7]  }
  0x59   : > { %591 = vmatpush3.bf16.msra.mxu0 %v588_v3  ;;  %628 = vmatpush3.bf16.msra.mxu1 %v588_v3  ;;  %v189_v12 = vld [vmem:[%s1002_s25 + $0x50] sm:$0xff]  ;;  %v600_v13 = vpack.c.bf16 %v204_v11, %v203_v10  ;;  %v604_v16 = vpack.c.bf16 %v206_v15, %v205_v14  ;;  %v208_v18 = vld [vmem:[#allocation5 + $0x58] sm:$0xff]  ;;  %v210_v21 = vld [vmem:[#allocation5 + $0x68] sm:$0xff]  ;;  %s761_s6 = sshll.u32 %s833_s3, 4  ;;  %s762_s6 = int_to_ptr.vmem [resolvable:$false] %s761_s6 }
  0x5a   : > { %593 = vmatprep.subr.bf16.mxu0 %v592_v5  ;;  %621 = vmatprep.subr.bf16.mxu1 %v592_v5  ;;  %v207_v17 = vld [vmem:[#allocation5 + $0x50] sm:$0xff]  ;;  %v209_v20 = vld [vmem:[#allocation5 + $0x60] sm:$0xff]  ;;  %v212_v24 = vld [vmem:[#allocation5 + $0x78] sm:$0xff]  ;;  %p759_p6 = pnand %p758_p4, %p945_p12  ;;  %s763_s7 = scalar_lea.vmem %s762_s6, 4608 }
  0x5b   : > { %561 = vmatprep.mubr.f32.mxu0 %v179_v9  ;;  %576 = vmatprep.mubr.f32.mxu1 %v189_v12  ;;  %v608_v19 = vpack.c.bf16 %v208_v18, %v207_v17  ;;  %v612_v22 = vpack.c.bf16 %v210_v21, %v209_v20  ;;  %v211_v23 = vld [vmem:[#allocation5 + $0x70] sm:$0xff]  ;;  %v180_v26 = vld [vmem:[%s1002_s25 + $0x8] sm:$0xff]  ;;  %v190_v27 = vld [vmem:[%s1002_s25 + $0x58] sm:$0xff]  ;;  %p764_p10 = scmp.lt.s32.totalorder %s1057_s4, %s762_s6  ;;  %p765_p11 = scmp.lt.s32.totalorder %s763_s7, %s757_s28 }
  0x5c   : > { %v616_v25 = vpack.c.bf16 %v212_v24, %v211_v23  ;;  %v181_v28 = vld [vmem:[%s1002_s25 + $0x10] sm:$0xff]  ;;  %v191_v29 = vld [vmem:[%s1002_s25 + $0x60] sm:$0xff]  ;;  %v182_v30 = vld [vmem:[%s1002_s25 + $0x18] sm:$0xff]  ;;  %p760_p8 = pneg %p759_p6 }
  0x5d   : > { %595 = vmatpush3.bf16.msra.mxu0 %v592_v5  ;;  %629 = vmatpush3.bf16.msra.mxu1 %v592_v5  ;;  %v192_v31 = vld [vmem:[%s1002_s25 + $0x68] sm:$0xff]  ;;  %v183_v32 = vld [vmem:[%s1002_s25 + $0x20] sm:$0xff]  ;;  %v193_v33 = vld [vmem:[%s1002_s25 + $0x70] sm:$0xff]  ;;  %p766_p3 = por %p765_p11, %p764_p10 }
  0x5e   : > { %597 = vmatprep.subr.bf16.mxu0 %v596_v8  ;;  %622 = vmatprep.subr.bf16.mxu1 %v596_v8  ;;  %v184_v34 = vld [vmem:[%s1002_s25 + $0x28] sm:$0xff]  ;;  %v194_v35 = vld [vmem:[%s1002_s25 + $0x78] sm:$0xff]  ;;  %v185_v36 = vld [vmem:[%s1002_s25 + $0x30] sm:$0xff] }
  0x5f   : > { %v195_v37 = vld [vmem:[%s1002_s25 + $0x80] sm:$0xff]  ;;  %v186_v38 = vld [vmem:[%s1002_s25 + $0x38] sm:$0xff]  ;;  %v196_v39 = vld [vmem:[%s1002_s25 + $0x88] sm:$0xff]  ;;  %p767_p7 = pnand %p766_p3, %p760_p8 }
  0x60   : > { %v187_v40 = vld [vmem:[%s1002_s25 + $0x40] sm:$0xff]  ;;  %v188_v41 = vld [vmem:[%s1002_s25 + $0x48] sm:$0xff] }
  0x61   : > { %599 = vmatpush3.bf16.msra.mxu0 %v596_v8  ;;  %630 = vmatpush3.bf16.msra.mxu1 %v596_v8 }
  0x62   : > { %601 = vmatprep.subr.bf16.mxu0 %v600_v13  ;;  %623 = vmatprep.subr.bf16.mxu1 %v600_v13 }
  0x65   : > { %603 = vmatpush3.bf16.msra.mxu0 %v600_v13  ;;  %631 = vmatpush3.bf16.msra.mxu1 %v600_v13 }
  0x66   : > { %605 = vmatprep.subr.bf16.mxu0 %v604_v16  ;;  %624 = vmatprep.subr.bf16.mxu1 %v604_v16 }
  0x69   : > { %607 = vmatpush3.bf16.msra.mxu0 %v604_v16  ;;  %632 = vmatpush3.bf16.msra.mxu1 %v604_v16 }
  0x6a   : > { %609 = vmatprep.subr.bf16.mxu0 %v608_v19  ;;  %625 = vmatprep.subr.bf16.mxu1 %v608_v19 }
  0x6d   : > { %611 = vmatpush3.bf16.msra.mxu0 %v608_v19  ;;  %633 = vmatpush3.bf16.msra.mxu1 %v608_v19 }
  0x6e   : > { %613 = vmatprep.subr.bf16.mxu0 %v612_v22  ;;  %626 = vmatprep.subr.bf16.mxu1 %v612_v22 }
  0x71   : > { %615 = vmatpush3.bf16.msra.mxu0 %v612_v22  ;;  %634 = vmatpush3.bf16.msra.mxu1 %v612_v22 }
  0x72   : > { %617 = vmatprep.subr.bf16.mxu0 %v616_v25  ;;  %627 = vmatprep.subr.bf16.mxu1 %v616_v25 }
  0x75   : > { %619 = vmatpush3.bf16.msra.mxu0 %v616_v25  ;;  %635 = vmatpush3.bf16.msra.mxu1 %v616_v25 }
  0x78   : > { %562 = vmatmul.mubr.f32.vlgmr.msra.gmra.mrb[0].mxu0 %v180_v26  ;;  %577 = vmatmul.mubr.f32.vlgmr.msra.gmra.mrb[0].mxu1 %v190_v27 }
  0x79   : > { %564 = vmatprep.mubr.f32.mxu0 %v181_v28  ;;  %579 = vmatprep.mubr.f32.mxu1 %v191_v29 }
  0x7c   : > { %565 = vmatmul.mubr.f32.gmra.mrb[2].mxu0 %v182_v30  ;;  %580 = vmatmul.mubr.f32.gmra.mrb[2].mxu1 %v192_v31 }
  0x7d   : > { %567 = vmatprep.mubr.f32.mxu0 %v183_v32  ;;  %582 = vmatprep.mubr.f32.mxu1 %v193_v33 }
  0x80   : > { %568 = vmatmul.mubr.f32.gmra.mrb[4].mxu0 %v184_v34  ;;  %583 = vmatmul.mubr.f32.gmra.mrb[4].mxu1 %v194_v35 }
  0x81   : > { %570 = vmatprep.mubr.f32.mxu0 %v185_v36  ;;  %585 = vmatprep.mubr.f32.mxu1 %v195_v37 }
  0x84   : > { %571 = vmatmul.mubr.f32.gmra.mrb[6].mxu0 %v186_v38  ;;  %586 = vmatmul.mubr.f32.gmra.mrb[6].mxu1 %v196_v39 }
  0x85   : > { %573 = vmatprep.mubr.f32.mxu0 %v187_v40 }
  0x88   : > { %574 = vmatmul.mubr.f32.gmra.mrb[8].mxu0 %v188_v41 }
 0x14b   : > { %v563_v42 = vpop.f32.mrb[0].mxu0  ;;  %v578_v43 = vpop.f32.mrb[0].mxu1 }
 0x14c   : > { %369 = vst [vmem:[%s1032_s15 + $0x8] sm:$0xff] %v563_v42  ;;  %v279_v44 = vpop.f32.mrb[1].mxu0  ;;  %379 = vst [vmem:[%s1032_s15 + $0x58] sm:$0xff] %v578_v43  ;;  %v329_v45 = vpop.f32.mrb[1].mxu1 }
 0x14d   : > { %368 = vst [vmem:[%s1032_s15] sm:$0xff] %v279_v44  ;;  %378 = vst [vmem:[%s1032_s15 + $0x50] sm:$0xff] %v329_v45 }
 0x14f   : > { %v566_v46 = vpop.f32.mrb[2].mxu0  ;;  %v581_v47 = vpop.f32.mrb[2].mxu1 }
 0x150   : > { %371 = vst [vmem:[%s1032_s15 + $0x18] sm:$0xff] %v566_v46  ;;  %v289_v48 = vpop.f32.mrb[3].mxu0  ;;  %381 = vst [vmem:[%s1032_s15 + $0x68] sm:$0xff] %v581_v47  ;;  %v339_v49 = vpop.f32.mrb[3].mxu1 }
 0x151   : > { %370 = vst [vmem:[%s1032_s15 + $0x10] sm:$0xff] %v289_v48  ;;  %380 = vst [vmem:[%s1032_s15 + $0x60] sm:$0xff] %v339_v49 }
 0x153   : > { %v569_v50 = vpop.f32.mrb[4].mxu0  ;;  %v584_v51 = vpop.f32.mrb[4].mxu1 }
 0x154   : > { %373 = vst [vmem:[%s1032_s15 + $0x28] sm:$0xff] %v569_v50  ;;  %v299_v52 = vpop.f32.mrb[5].mxu0  ;;  %383 = vst [vmem:[%s1032_s15 + $0x78] sm:$0xff] %v584_v51  ;;  %v349_v53 = vpop.f32.mrb[5].mxu1 }
 0x155   : > { %372 = vst [vmem:[%s1032_s15 + $0x20] sm:$0xff] %v299_v52  ;;  %382 = vst [vmem:[%s1032_s15 + $0x70] sm:$0xff] %v349_v53 }
 0x157   : > { %v572_v54 = vpop.f32.mrb[6].mxu0  ;;  %v587_v55 = vpop.f32.mrb[6].mxu1 }
 0x158   : > { %375 = vst [vmem:[%s1032_s15 + $0x38] sm:$0xff] %v572_v54  ;;  %v309_v56 = vpop.f32.mrb[7].mxu0  ;;  %385 = vst [vmem:[%s1032_s15 + $0x88] sm:$0xff] %v587_v55  ;;  %v359_v57 = vpop.f32.mrb[7].mxu1 }
 0x159   : > { %374 = vst [vmem:[%s1032_s15 + $0x30] sm:$0xff] %v309_v56  ;;  %384 = vst [vmem:[%s1032_s15 + $0x80] sm:$0xff] %v359_v57 }
 0x15b   : > { %v575_v58 = vpop.f32.mrb[8].mxu0 }
 0x15c   : > { %377 = vst [vmem:[%s1032_s15 + $0x48] sm:$0xff] %v575_v58  ;;  %v319_v59 = vpop.f32.mrb[9].mxu0 }
 0x15d   : > { %376 = vst [vmem:[%s1032_s15 + $0x40] sm:$0xff] %v319_v59 }
 0x15e   : > { %770 = shalt.err (!%p767_p7)
}
 0x15f   : > { %s771_s20 = scalar_lea.hbm %s1055_s27, 2304  ;;  %s775_s19 = scalar_lea.hbm %s1105_s2, 4608 }
 0x160   : > { %p772_p9 = scmp.ne.s32.totalorder %s1055_s27, %s771_s20  ;;  %p776_p5 = scmp.lt.u32.totalorder %s1055_s27, %s1105_s2 }
 0x161   : > { %p777_p13 = scmp.lt.u32.totalorder %s775_s19, %s771_s20  ;;  %p779_p4 = scmp.lt.u32.totalorder %s771_s20, %s1055_s27 }
 0x162   : > { %p773_p1 = pnand %p772_p9, %p945_p12 }
 0x163   : > { %p778_p2 = por %p777_p13, %p776_p5 }
 0x164   : > { %p774_p0 = pneg %p773_p1 }
 0x165   : > { %p780_p6 = por %p779_p4, %p778_p2 }
 0x167   : > { %p781_p8 = pnand %p780_p6, %p774_p0 }
 0x169   : > { %784 = shalt.err (!%p781_p8)
}
 0x16a   : > { %s834_s30 = smov 128   ;;  %s835_s25 = smov 8  }
 0x16b   : > { %644 = dma.vmem_to_hbm [thread:$0]  (%p945_p12), %s1057_s4, 2304, %s1055_s27, %s387_s13, %s834_s30, %s834_s30, %s835_s25  }
 0x16c PF: > { %s415_s15 = sand.u32 1, %s815_s9   ;;  %p1120_p10 = scmp.ne.s32.totalorder %s1110_s16, 0 }
 0x16d   : > { %p1121_p11 = scmp.ge.s32.totalorder %s827_s12, 2  ;;  %s416_s17 = scalar_lea.sflag [#allocation4], %s415_s15 }
 0x16f   : > { %p655_p3 = pnand %p1121_p11, %p1120_p10 }
 0x171   : > { %810 = dma.done.wait (!%p655_p3), %s416_s17, 2304  }
 0x172   : > { %812 = vsyncadd (!%p655_p3), %s416_s17, 4294964992  ;;  %p16_p7 = scmp.ge.s32.totalorder %s907_s21, 4   ;;  %s1122_s9 = smov %s819_s10 }
 0x173   : > { %s1123_s10 = smov %s823_s11  ;;  %s1124_s11 = smov %s941_s8 }
 0x174   : > { %s1125_s12 = smov %s907_s21  ;;  %18 = sbr.rel (!%p16_p7) target bundleno = 6 (0x6), region = 77 }
 0x17b   :  { %421 = vsyncpa [#allocation3], 1 }
 0x17c   :  { %423 = vsyncpa [#allocation3 + $0x1], 1 }
 0x17d   :  { %424 = vsyncpa [#allocation6], 1 }
 0x17e   :  { %425 = vsyncpa [#allocation4], 1 }
 0x17f   :  { %427 = vsyncpa [#allocation4 + $0x1], 1 }

</bundles_post_ra>
